<compile_context>
chip_gen: v5e
topology: v5e:2x2
jax: 0.10.0
libtpu: 0.0.40
codegen_flags: <defaults>
</compile_context>

<pallas_src>
import numpy as np
import jax
import jax.numpy as jnp
from jax import lax
from jax.experimental import pallas as pl
from jax.experimental.pallas import tpu as pltpu

# ---------------------------------------------------------------------------
# Descriptor constants
# ---------------------------------------------------------------------------
MUL = 2                       # multiplicity of every operand ("2x1")
LDIM = 3                      # dim of l=1 irrep
DIM = MUL * LDIM              # 6 : operand dim for x1, x2, out
NW = MUL * MUL * MUL          # 8 : number of path weights

LANES = 128                   # batch maps onto the 128 lanes
SUB = 8                       # sublane quantum / in-kernel chunk size
MAX_BTS = 512                 # max sublane-groups per grid step (<=14 MiB 2x-buffered)
MAX_TABLE_ROWS = 8            # SMEM where-chain gather cap (keeps VALU below DMA
                              # on v6e/v7x; v5e could tolerate 16)

# alpha * w3j normalization, folded wrapper-side into the weights.
_SCALE = float((1.0 / np.sqrt(MUL * MUL)) / np.sqrt(6.0))


def _cdiv(a, b):
    return -(-a // b)


def _round_up(a, b):
    return _cdiv(a, b) * b


def _dense_path_tensor():
    """Dense T[p, a, b, o] used only by the pure-JAX reference."""
    eps = np.zeros((3, 3, 3), np.float64)
    eps[0, 1, 2] = eps[1, 2, 0] = eps[2, 0, 1] = 1.0
    eps[0, 2, 1] = eps[2, 1, 0] = eps[1, 0, 2] = -1.0
    w3j = eps / np.sqrt(6.0)
    alpha = 1.0 / np.sqrt(MUL * MUL)
    T = np.zeros((NW, DIM, DIM, DIM), np.float64)
    for i in range(MUL):
        for j in range(MUL):
            for u in range(MUL):
                p = (i * MUL + j) * MUL + u
                T[p, i * 3:(i + 1) * 3, j * 3:(j + 1) * 3, u * 3:(u + 1) * 3] = \
                    alpha * w3j
    return jnp.asarray(T, jnp.float32)


T_DENSE = _dense_path_tensor()


# ---------------------------------------------------------------------------
# Kernel construction.  Blocks arrive lane-dense:
#   x1/x2/out : (6, bts, 128),  batched weights : (8, bts, 128),
#   shared weights : (8,) in SMEM,  indexed table : (nrows, 8) in SMEM
#   + idx : (bts, 128) int32.
# The block is processed in 8-sublane chunks so the live vreg set stays small
# regardless of bts (bts itself only sizes the DMAs).
# ---------------------------------------------------------------------------
def _build_kernel(mode, *, bts, nrows=None):
    csz = min(SUB, bts)              # chunk height in sublane-groups
    n_chunks = bts // csz            # bts <= 8 -> 1 chunk; else bts is a multiple of 8
    f32 = jnp.float32

    def tp_chunk(sl, getw, x1_ref, x2_ref, o_ref):
        # Load the 12 input planes for this chunk, do 4 weighted cross products,
        # accumulate into 6 output planes, store.  ~84 VPU ops, ~25 live vregs.
        a = [x1_ref[comp, sl, :].astype(f32) for comp in range(DIM)]
        b = [x2_ref[comp, sl, :].astype(f32) for comp in range(DIM)]
        acc = [None] * DIM
        for i in range(MUL):
            a0, a1, a2 = a[3 * i], a[3 * i + 1], a[3 * i + 2]
            for j in range(MUL):
                b0, b1, b2 = b[3 * j], b[3 * j + 1], b[3 * j + 2]
                cr = (a1 * b2 - a2 * b1,
                      a2 * b0 - a0 * b2,
                      a0 * b1 - a1 * b0)
                for u in range(MUL):
                    w = getw(i, j, u, sl)
                    for k in range(LDIM):
                        o = u * LDIM + k
                        t = w * cr[k]
                        acc[o] = t if acc[o] is None else acc[o] + t
        for o in range(DIM):
            o_ref[o, sl, :] = acc[o].astype(o_ref.dtype)

    def run_chunks(chunk_fn):
        if n_chunks == 1:
            chunk_fn(pl.ds(0, csz))
        else:
            def body(c, carry):
                off = pl.multiple_of(c * csz, csz)   # aligned to sublane quantum
                chunk_fn(pl.ds(off, csz))
                return carry
            lax.fori_loop(0, n_chunks, body, jnp.int32(0))

    if mode == "batched":
        def kernel(w_ref, x1_ref, x2_ref, o_ref):
            def getw(i, j, u, sl):
                p = (i * MUL + j) * MUL + u
                return w_ref[p, sl, :].astype(f32)      # each plane used once

            run_chunks(lambda sl: tp_chunk(sl, getw, x1_ref, x2_ref, o_ref))
        return kernel

    if mode == "shared":
        def kernel(w_ref, x1_ref, x2_ref, o_ref):
            # 8 scalars, SMEM-resident for the whole grid (no broadcast planes).
            w = [w_ref[p] for p in range(NW)]

            def getw(i, j, u, sl):
                return w[(i * MUL + j) * MUL + u]

            run_chunks(lambda sl: tp_chunk(sl, getw, x1_ref, x2_ref, o_ref))
        return kernel

    assert mode == "indexed"

    def kernel(tbl_ref, idx_ref, x1_ref, x2_ref, o_ref):
        def chunk(sl):
            # Expand the (nrows, 8) SMEM table into 8 weight planes for this
            # chunk with a short where-chain (nrows <= MAX_TABLE_ROWS).
            # Indices are clamped wrapper-side; padded rows read row 0 which is
            # harmless because padded x1/x2 rows are zero.
            idx = idx_ref[sl, :]
            planes = [jnp.zeros(idx.shape, f32) for _ in range(NW)]
            for r in range(nrows):
                m = idx == r
                for p in range(NW):
                    planes[p] = jnp.where(m, tbl_ref[r, p], planes[p])
            tp_chunk(sl, lambda i, j, u, _: planes[(i * MUL + j) * MUL + u],
                     x1_ref, x2_ref, o_ref)

        run_chunks(chunk)
    return kernel


# ---------------------------------------------------------------------------
# Tiling: batch rows -> 128-lane groups; groups -> grid tiles of `bts` groups.
# ---------------------------------------------------------------------------
def _tiling(Z):
    Gp = _cdiv(Z, LANES)                  # number of 128-row lane groups
    if Gp <= SUB:
        return Gp, 1, Gp                  # tiny: one block covering everything
    # Force >= 2 (and preferably an even number of) grid steps so the parallel
    # axis can be sharded across both TensorCores on v7x; negligible cost on
    # single-TC chips.
    n_tiles = max(2, _cdiv(Gp, MAX_BTS))
    if n_tiles % 2:
        n_tiles += 1
    bts = _round_up(_cdiv(Gp, n_tiles), SUB)
    n_tiles = _cdiv(Gp, bts)              # ragged edge handled by Pallas masking
    return bts, n_tiles, Gp


# ---------------------------------------------------------------------------
# Wrapper (mirrors EquivariantTensorProduct.forward with the TPDispatcher)
# ---------------------------------------------------------------------------
def equivariant_tensor_product(x0, x1, x2, indices=None):
    assert x0.ndim == 2 and x0.shape[1] == NW
    assert x1.ndim == 2 and x1.shape[1] == DIM
    assert x2.ndim == 2 and x2.shape[1] == DIM
    assert x1.shape[0] == x2.shape[0]
    Z = x1.shape[0]
    out_dtype = x1.dtype

    bts, n_tiles, Gp = _tiling(Z)
    Zp = Gp * LANES                       # pad is at most 127 rows

    def to_lane_dense(a, d, scale=None):
        # pad(+scale)+transpose+reshape written as one chain so XLA fuses it
        # into a single HBM pass per operand under jit.
        if scale is not None:
            a = a * jnp.asarray(scale, a.dtype)
        a = jnp.pad(a, ((0, Zp - Z), (0, 0)))
        return a.T.reshape(d, Gp, LANES)

    x1_ld = to_lane_dense(x1, DIM)
    x2_ld = to_lane_dense(x2, DIM)
    data_spec = pl.BlockSpec((DIM, bts, LANES), lambda g: (0, g, 0))

    n_planes = 3 * DIM                    # x1 + x2 + out planes per grid step

    if indices is not None and x0.shape[0] <= MAX_TABLE_ROWS:
        # In-kernel gather: the whole weight table stays resident in SMEM and
        # only int32 indices stream from HBM (no gathered (Z, 8) array).
        assert indices.ndim == 1 and indices.shape[0] == Z
        nrows = x0.shape[0]
        # Clamp to match XLA gather semantics of the fallback path.
        idx = jnp.clip(indices.astype(jnp.int32), 0, nrows - 1)
        idx = jnp.pad(idx, ((0, Zp - Z),)).reshape(Gp, LANES)
        tbl = x0.astype(jnp.float32) * _SCALE          # scale folded into table
        kernel = _build_kernel("indexed", bts=bts, nrows=nrows)
        extra_inputs = (tbl, idx)
        extra_specs = (pl.BlockSpec(memory_space=pltpu.MemorySpace.SMEM),
                       pl.BlockSpec((bts, LANES), lambda g: (g, 0)))
        n_planes += 1                                   # idx plane
    elif indices is None and x0.shape[0] == 1:
        # Shared weights: 8 scalars SMEM-resident across the grid.
        w_s = x0[0].astype(jnp.float32) * _SCALE        # (8,)
        kernel = _build_kernel("shared", bts=bts)
        extra_inputs = (w_s,)
        extra_specs = (pl.BlockSpec(memory_space=pltpu.MemorySpace.SMEM),)
    else:
        if indices is not None:
            # Large table: gather directly into the lane-dense layout in one
            # fused pass (no intermediate (Z, 8) row-major gather in HBM).
            idx = jnp.clip(indices.astype(jnp.int32), 0, x0.shape[0] - 1)
            idx = jnp.pad(idx, ((0, Zp - Z),))
            w_t = (x0 * jnp.asarray(_SCALE, x0.dtype)).T        # (8, nrows) tiny
            w_ld = jnp.take(w_t, idx, axis=1).reshape(NW, Gp, LANES)
        else:
            assert x0.shape[0] == Z, "weights batch must be 1, Z, or indexed"
            w_ld = to_lane_dense(x0, NW, scale=_SCALE)
        kernel = _build_kernel("batched", bts=bts)
        extra_inputs = (w_ld,)
        extra_specs = (pl.BlockSpec((NW, bts, LANES), lambda g: (0, g, 0)),)
        n_planes += NW

    # VMEM limit from the actual double-buffered working set (+ headroom);
    # at bts=512 this is ~18 MiB, within v5e/v6e/v7x budgets.
    ws = 2 * n_planes * bts * LANES * 4
    vmem_limit = int(max(ws + (4 << 20), 16 << 20))

    out_ld = pl.pallas_call(
        kernel,
        out_shape=jax.ShapeDtypeStruct((DIM, Gp, LANES), out_dtype),
        grid_spec=pltpu.PrefetchScalarGridSpec(
            num_scalar_prefetch=0,
            grid=(n_tiles,),
            in_specs=list(extra_specs) + [data_spec, data_spec],
            out_specs=pl.BlockSpec((DIM, bts, LANES), lambda g: (0, g, 0)),
        ),
        compiler_params=pltpu.CompilerParams(
            dimension_semantics=("parallel",),
            vmem_limit_bytes=vmem_limit,
        ),
    )(*extra_inputs, x1_ld, x2_ld)

    # Back to (Z, 6).
    # TODO(synk): keep the (dim, Z/128, 128) lane-dense layout as the persistent
    # format across adjacent ops (or use allow_input_fusion) to drop this and
    # the input transposes — the remaining ~2x HBM traffic of the wrapper.
    return out_ld.reshape(DIM, Zp)[:, :Z].T


# ---------------------------------------------------------------------------
# Pure-JAX reference
# ---------------------------------------------------------------------------
def _reference(x0, x1, x2, indices=None):
    Z = x1.shape[0]
    if indices is not None:
        x0 = x0[indices]
    elif x0.shape[0] == 1:
        x0 = jnp.broadcast_to(x0, (Z, NW))
    return jnp.einsum("zp,za,zb,pabo->zo", x0, x1, x2, T_DENSE)


if __name__ == "__main__":
    key = jax.random.PRNGKey(0)
    keys = jax.random.split(key, 10)

    Z = 17
    x1 = jax.random.normal(keys[0], (Z, DIM), jnp.float32)
    x2 = jax.random.normal(keys[1], (Z, DIM), jnp.float32)

    # (a) indexed weights, small table -> in-kernel SMEM where-chain gather
    w3 = jax.random.normal(keys[2], (3, NW), jnp.float32)
    idx3 = jax.random.randint(keys[3], (Z,), 0, 3, dtype=jnp.int32)
    out_a = jax.block_until_ready(equivariant_tensor_product(w3, x1, x2, indices=idx3))
    np.testing.assert_allclose(np.asarray(out_a),
                               np.asarray(_reference(w3, x1, x2, idx3)),
                               rtol=1e-5, atol=1e-5)

    # (b) shared batch-1 weights (docstring example) -> SMEM-resident scalars
    w1 = jax.random.normal(keys[4], (1, NW), jnp.float32)
    out_b = jax.block_until_ready(equivariant_tensor_product(w1, x1, x2))
    np.testing.assert_allclose(np.asarray(out_b),
                               np.asarray(_reference(w1, x1, x2)),
                               rtol=1e-5, atol=1e-5)

    # (c) fully batched weights: >=2 grid steps, ragged edge (masked last block),
    #     multiple 8-sublane chunks per block, run under jit so the wrapper
    #     layout conversions fuse.
    Z2 = 2067
    wz = jax.random.normal(keys[5], (Z2, NW), jnp.float32)
    x1z = jax.random.normal(keys[6], (Z2, DIM), jnp.float32)
    x2z = jax.random.normal(keys[7], (Z2, DIM), jnp.float32)
    f = jax.jit(equivariant_tensor_product)
    out_c = jax.block_until_ready(f(wz, x1z, x2z))
    np.testing.assert_allclose(np.asarray(out_c),
                               np.asarray(_reference(wz, x1z, x2z)),
                               rtol=1e-5, atol=1e-5)

    # (d) indexed weights, table too large for the SMEM path -> fused lane-dense gather
    w20 = jax.random.normal(keys[8], (20, NW), jnp.float32)
    idx20 = jax.random.randint(keys[9], (Z,), 0, 20, dtype=jnp.int32)
    out_d = jax.block_until_ready(equivariant_tensor_product(w20, x1, x2, indices=idx20))
    np.testing.assert_allclose(np.asarray(out_d),
                               np.asarray(_reference(w20, x1, x2, idx20)),
                               rtol=1e-5, atol=1e-5)

    print("KERNEL_OK")
</pallas_src>

<mosaic_0001>
module attributes {stable_mosaic.version = 11 : i64} {
  func.func @kernel(%arg0: i32, %arg1: memref<3x8xf32, #tpu.memory_space<smem>>, %arg2: memref<1x128xi32, #tpu.memory_space<vmem>>, %arg3: memref<6x1x128xf32, #tpu.memory_space<vmem>>, %arg4: memref<6x1x128xf32, #tpu.memory_space<vmem>>, %arg5: memref<6x1x128xf32, #tpu.memory_space<vmem>>) attributes {dimension_semantics = [#tpu.dimension_semantics<parallel>], iteration_bounds = array<i64: 1>, scalar_prefetch = 0 : i64, scratch_operands = 0 : i64, tpu.core_type = #tpu.core_type<tc>, window_params = [{transform_indices = @transform_0, window_bounds = array<i64: 3, 8>}, {transform_indices = @transform_1, window_bounds = array<i64: 1, 128>}, {transform_indices = @transform_2, window_bounds = array<i64: 6, 1, 128>}, {transform_indices = @transform_3, window_bounds = array<i64: 6, 1, 128>}, {transform_indices = @transform_4, window_bounds = array<i64: 6, 1, 128>}]} {
    %c0 = arith.constant 0 : index
    %c0_0 = arith.constant 0 : index
    %0 = vector.load %arg2[%c0, %c0_0] : memref<1x128xi32, #tpu.memory_space<vmem>>, vector<1x128xi32>
    %cst = arith.constant 0.000000e+00 : f32
    %1 = vector.broadcast %cst : f32 to vector<1x128xf32>
    %cst_1 = arith.constant 0.000000e+00 : f32
    %2 = vector.broadcast %cst_1 : f32 to vector<1x128xf32>
    %cst_2 = arith.constant 0.000000e+00 : f32
    %3 = vector.broadcast %cst_2 : f32 to vector<1x128xf32>
    %cst_3 = arith.constant 0.000000e+00 : f32
    %4 = vector.broadcast %cst_3 : f32 to vector<1x128xf32>
    %cst_4 = arith.constant 0.000000e+00 : f32
    %5 = vector.broadcast %cst_4 : f32 to vector<1x128xf32>
    %cst_5 = arith.constant 0.000000e+00 : f32
    %6 = vector.broadcast %cst_5 : f32 to vector<1x128xf32>
    %cst_6 = arith.constant 0.000000e+00 : f32
    %7 = vector.broadcast %cst_6 : f32 to vector<1x128xf32>
    %cst_7 = arith.constant 0.000000e+00 : f32
    %8 = vector.broadcast %cst_7 : f32 to vector<1x128xf32>
    %c0_i32 = arith.constant 0 : i32
    %9 = vector.broadcast %c0_i32 : i32 to vector<1x128xi32>
    %10 = arith.cmpi eq, %0, %9 : vector<1x128xi32>
    %c0_8 = arith.constant 0 : index
    %c0_9 = arith.constant 0 : index
    %11 = memref.load %arg1[%c0_8, %c0_9] : memref<3x8xf32, #tpu.memory_space<smem>>
    %12 = vector.broadcast %11 : f32 to vector<1x128xf32>
    %13 = arith.select %10, %12, %1 : vector<1x128xi1>, vector<1x128xf32>
    %c0_10 = arith.constant 0 : index
    %c1 = arith.constant 1 : index
    %14 = memref.load %arg1[%c0_10, %c1] : memref<3x8xf32, #tpu.memory_space<smem>>
    %15 = vector.broadcast %14 : f32 to vector<1x128xf32>
    %16 = arith.select %10, %15, %2 : vector<1x128xi1>, vector<1x128xf32>
    %c0_11 = arith.constant 0 : index
    %c2 = arith.constant 2 : index
    %17 = memref.load %arg1[%c0_11, %c2] : memref<3x8xf32, #tpu.memory_space<smem>>
    %18 = vector.broadcast %17 : f32 to vector<1x128xf32>
    %19 = arith.select %10, %18, %3 : vector<1x128xi1>, vector<1x128xf32>
    %c0_12 = arith.constant 0 : index
    %c3 = arith.constant 3 : index
    %20 = memref.load %arg1[%c0_12, %c3] : memref<3x8xf32, #tpu.memory_space<smem>>
    %21 = vector.broadcast %20 : f32 to vector<1x128xf32>
    %22 = arith.select %10, %21, %4 : vector<1x128xi1>, vector<1x128xf32>
    %c0_13 = arith.constant 0 : index
    %c4 = arith.constant 4 : index
    %23 = memref.load %arg1[%c0_13, %c4] : memref<3x8xf32, #tpu.memory_space<smem>>
    %24 = vector.broadcast %23 : f32 to vector<1x128xf32>
    %25 = arith.select %10, %24, %5 : vector<1x128xi1>, vector<1x128xf32>
    %c0_14 = arith.constant 0 : index
    %c5 = arith.constant 5 : index
    %26 = memref.load %arg1[%c0_14, %c5] : memref<3x8xf32, #tpu.memory_space<smem>>
    %27 = vector.broadcast %26 : f32 to vector<1x128xf32>
    %28 = arith.select %10, %27, %6 : vector<1x128xi1>, vector<1x128xf32>
    %c0_15 = arith.constant 0 : index
    %c6 = arith.constant 6 : index
    %29 = memref.load %arg1[%c0_15, %c6] : memref<3x8xf32, #tpu.memory_space<smem>>
    %30 = vector.broadcast %29 : f32 to vector<1x128xf32>
    %31 = arith.select %10, %30, %7 : vector<1x128xi1>, vector<1x128xf32>
    %c0_16 = arith.constant 0 : index
    %c7 = arith.constant 7 : index
    %32 = memref.load %arg1[%c0_16, %c7] : memref<3x8xf32, #tpu.memory_space<smem>>
    %33 = vector.broadcast %32 : f32 to vector<1x128xf32>
    %34 = arith.select %10, %33, %8 : vector<1x128xi1>, vector<1x128xf32>
    %c1_i32 = arith.constant 1 : i32
    %35 = vector.broadcast %c1_i32 : i32 to vector<1x128xi32>
    %36 = arith.cmpi eq, %0, %35 : vector<1x128xi32>
    %c1_17 = arith.constant 1 : index
    %c0_18 = arith.constant 0 : index
    %37 = memref.load %arg1[%c1_17, %c0_18] : memref<3x8xf32, #tpu.memory_space<smem>>
    %38 = vector.broadcast %37 : f32 to vector<1x128xf32>
    %39 = arith.select %36, %38, %13 : vector<1x128xi1>, vector<1x128xf32>
    %c1_19 = arith.constant 1 : index
    %c1_20 = arith.constant 1 : index
    %40 = memref.load %arg1[%c1_19, %c1_20] : memref<3x8xf32, #tpu.memory_space<smem>>
    %41 = vector.broadcast %40 : f32 to vector<1x128xf32>
    %42 = arith.select %36, %41, %16 : vector<1x128xi1>, vector<1x128xf32>
    %c1_21 = arith.constant 1 : index
    %c2_22 = arith.constant 2 : index
    %43 = memref.load %arg1[%c1_21, %c2_22] : memref<3x8xf32, #tpu.memory_space<smem>>
    %44 = vector.broadcast %43 : f32 to vector<1x128xf32>
    %45 = arith.select %36, %44, %19 : vector<1x128xi1>, vector<1x128xf32>
    %c1_23 = arith.constant 1 : index
    %c3_24 = arith.constant 3 : index
    %46 = memref.load %arg1[%c1_23, %c3_24] : memref<3x8xf32, #tpu.memory_space<smem>>
    %47 = vector.broadcast %46 : f32 to vector<1x128xf32>
    %48 = arith.select %36, %47, %22 : vector<1x128xi1>, vector<1x128xf32>
    %c1_25 = arith.constant 1 : index
    %c4_26 = arith.constant 4 : index
    %49 = memref.load %arg1[%c1_25, %c4_26] : memref<3x8xf32, #tpu.memory_space<smem>>
    %50 = vector.broadcast %49 : f32 to vector<1x128xf32>
    %51 = arith.select %36, %50, %25 : vector<1x128xi1>, vector<1x128xf32>
    %c1_27 = arith.constant 1 : index
    %c5_28 = arith.constant 5 : index
    %52 = memref.load %arg1[%c1_27, %c5_28] : memref<3x8xf32, #tpu.memory_space<smem>>
    %53 = vector.broadcast %52 : f32 to vector<1x128xf32>
    %54 = arith.select %36, %53, %28 : vector<1x128xi1>, vector<1x128xf32>
    %c1_29 = arith.constant 1 : index
    %c6_30 = arith.constant 6 : index
    %55 = memref.load %arg1[%c1_29, %c6_30] : memref<3x8xf32, #tpu.memory_space<smem>>
    %56 = vector.broadcast %55 : f32 to vector<1x128xf32>
    %57 = arith.select %36, %56, %31 : vector<1x128xi1>, vector<1x128xf32>
    %c1_31 = arith.constant 1 : index
    %c7_32 = arith.constant 7 : index
    %58 = memref.load %arg1[%c1_31, %c7_32] : memref<3x8xf32, #tpu.memory_space<smem>>
    %59 = vector.broadcast %58 : f32 to vector<1x128xf32>
    %60 = arith.select %36, %59, %34 : vector<1x128xi1>, vector<1x128xf32>
    %c2_i32 = arith.constant 2 : i32
    %61 = vector.broadcast %c2_i32 : i32 to vector<1x128xi32>
    %62 = arith.cmpi eq, %0, %61 : vector<1x128xi32>
    %c2_33 = arith.constant 2 : index
    %c0_34 = arith.constant 0 : index
    %63 = memref.load %arg1[%c2_33, %c0_34] : memref<3x8xf32, #tpu.memory_space<smem>>
    %64 = vector.broadcast %63 : f32 to vector<1x128xf32>
    %65 = arith.select %62, %64, %39 : vector<1x128xi1>, vector<1x128xf32>
    %c2_35 = arith.constant 2 : index
    %c1_36 = arith.constant 1 : index
    %66 = memref.load %arg1[%c2_35, %c1_36] : memref<3x8xf32, #tpu.memory_space<smem>>
    %67 = vector.broadcast %66 : f32 to vector<1x128xf32>
    %68 = arith.select %62, %67, %42 : vector<1x128xi1>, vector<1x128xf32>
    %c2_37 = arith.constant 2 : index
    %c2_38 = arith.constant 2 : index
    %69 = memref.load %arg1[%c2_37, %c2_38] : memref<3x8xf32, #tpu.memory_space<smem>>
    %70 = vector.broadcast %69 : f32 to vector<1x128xf32>
    %71 = arith.select %62, %70, %45 : vector<1x128xi1>, vector<1x128xf32>
    %c2_39 = arith.constant 2 : index
    %c3_40 = arith.constant 3 : index
    %72 = memref.load %arg1[%c2_39, %c3_40] : memref<3x8xf32, #tpu.memory_space<smem>>
    %73 = vector.broadcast %72 : f32 to vector<1x128xf32>
    %74 = arith.select %62, %73, %48 : vector<1x128xi1>, vector<1x128xf32>
    %c2_41 = arith.constant 2 : index
    %c4_42 = arith.constant 4 : index
    %75 = memref.load %arg1[%c2_41, %c4_42] : memref<3x8xf32, #tpu.memory_space<smem>>
    %76 = vector.broadcast %75 : f32 to vector<1x128xf32>
    %77 = arith.select %62, %76, %51 : vector<1x128xi1>, vector<1x128xf32>
    %c2_43 = arith.constant 2 : index
    %c5_44 = arith.constant 5 : index
    %78 = memref.load %arg1[%c2_43, %c5_44] : memref<3x8xf32, #tpu.memory_space<smem>>
    %79 = vector.broadcast %78 : f32 to vector<1x128xf32>
    %80 = arith.select %62, %79, %54 : vector<1x128xi1>, vector<1x128xf32>
    %c2_45 = arith.constant 2 : index
    %c6_46 = arith.constant 6 : index
    %81 = memref.load %arg1[%c2_45, %c6_46] : memref<3x8xf32, #tpu.memory_space<smem>>
    %82 = vector.broadcast %81 : f32 to vector<1x128xf32>
    %83 = arith.select %62, %82, %57 : vector<1x128xi1>, vector<1x128xf32>
    %c2_47 = arith.constant 2 : index
    %c7_48 = arith.constant 7 : index
    %84 = memref.load %arg1[%c2_47, %c7_48] : memref<3x8xf32, #tpu.memory_space<smem>>
    %85 = vector.broadcast %84 : f32 to vector<1x128xf32>
    %86 = arith.select %62, %85, %60 : vector<1x128xi1>, vector<1x128xf32>
    %c0_49 = arith.constant 0 : index
    %c0_50 = arith.constant 0 : index
    %c0_51 = arith.constant 0 : index
    %87 = vector.load %arg3[%c0_49, %c0_50, %c0_51] : memref<6x1x128xf32, #tpu.memory_space<vmem>>, vector<1x1x128xf32>
    %88 = vector.shape_cast %87 : vector<1x1x128xf32> to vector<1x128xf32>
    %c1_52 = arith.constant 1 : index
    %c0_53 = arith.constant 0 : index
    %c0_54 = arith.constant 0 : index
    %89 = vector.load %arg3[%c1_52, %c0_53, %c0_54] : memref<6x1x128xf32, #tpu.memory_space<vmem>>, vector<1x1x128xf32>
    %90 = vector.shape_cast %89 : vector<1x1x128xf32> to vector<1x128xf32>
    %c2_55 = arith.constant 2 : index
    %c0_56 = arith.constant 0 : index
    %c0_57 = arith.constant 0 : index
    %91 = vector.load %arg3[%c2_55, %c0_56, %c0_57] : memref<6x1x128xf32, #tpu.memory_space<vmem>>, vector<1x1x128xf32>
    %92 = vector.shape_cast %91 : vector<1x1x128xf32> to vector<1x128xf32>
    %c3_58 = arith.constant 3 : index
    %c0_59 = arith.constant 0 : index
    %c0_60 = arith.constant 0 : index
    %93 = vector.load %arg3[%c3_58, %c0_59, %c0_60] : memref<6x1x128xf32, #tpu.memory_space<vmem>>, vector<1x1x128xf32>
    %94 = vector.shape_cast %93 : vector<1x1x128xf32> to vector<1x128xf32>
    %c4_61 = arith.constant 4 : index
    %c0_62 = arith.constant 0 : index
    %c0_63 = arith.constant 0 : index
    %95 = vector.load %arg3[%c4_61, %c0_62, %c0_63] : memref<6x1x128xf32, #tpu.memory_space<vmem>>, vector<1x1x128xf32>
    %96 = vector.shape_cast %95 : vector<1x1x128xf32> to vector<1x128xf32>
    %c5_64 = arith.constant 5 : index
    %c0_65 = arith.constant 0 : index
    %c0_66 = arith.constant 0 : index
    %97 = vector.load %arg3[%c5_64, %c0_65, %c0_66] : memref<6x1x128xf32, #tpu.memory_space<vmem>>, vector<1x1x128xf32>
    %98 = vector.shape_cast %97 : vector<1x1x128xf32> to vector<1x128xf32>
    %c0_67 = arith.constant 0 : index
    %c0_68 = arith.constant 0 : index
    %c0_69 = arith.constant 0 : index
    %99 = vector.load %arg4[%c0_67, %c0_68, %c0_69] : memref<6x1x128xf32, #tpu.memory_space<vmem>>, vector<1x1x128xf32>
    %100 = vector.shape_cast %99 : vector<1x1x128xf32> to vector<1x128xf32>
    %c1_70 = arith.constant 1 : index
    %c0_71 = arith.constant 0 : index
    %c0_72 = arith.constant 0 : index
    %101 = vector.load %arg4[%c1_70, %c0_71, %c0_72] : memref<6x1x128xf32, #tpu.memory_space<vmem>>, vector<1x1x128xf32>
    %102 = vector.shape_cast %101 : vector<1x1x128xf32> to vector<1x128xf32>
    %c2_73 = arith.constant 2 : index
    %c0_74 = arith.constant 0 : index
    %c0_75 = arith.constant 0 : index
    %103 = vector.load %arg4[%c2_73, %c0_74, %c0_75] : memref<6x1x128xf32, #tpu.memory_space<vmem>>, vector<1x1x128xf32>
    %104 = vector.shape_cast %103 : vector<1x1x128xf32> to vector<1x128xf32>
    %c3_76 = arith.constant 3 : index
    %c0_77 = arith.constant 0 : index
    %c0_78 = arith.constant 0 : index
    %105 = vector.load %arg4[%c3_76, %c0_77, %c0_78] : memref<6x1x128xf32, #tpu.memory_space<vmem>>, vector<1x1x128xf32>
    %106 = vector.shape_cast %105 : vector<1x1x128xf32> to vector<1x128xf32>
    %c4_79 = arith.constant 4 : index
    %c0_80 = arith.constant 0 : index
    %c0_81 = arith.constant 0 : index
    %107 = vector.load %arg4[%c4_79, %c0_80, %c0_81] : memref<6x1x128xf32, #tpu.memory_space<vmem>>, vector<1x1x128xf32>
    %108 = vector.shape_cast %107 : vector<1x1x128xf32> to vector<1x128xf32>
    %c5_82 = arith.constant 5 : index
    %c0_83 = arith.constant 0 : index
    %c0_84 = arith.constant 0 : index
    %109 = vector.load %arg4[%c5_82, %c0_83, %c0_84] : memref<6x1x128xf32, #tpu.memory_space<vmem>>, vector<1x1x128xf32>
    %110 = vector.shape_cast %109 : vector<1x1x128xf32> to vector<1x128xf32>
    %111 = arith.mulf %90, %104 : vector<1x128xf32>
    %112 = arith.mulf %92, %102 : vector<1x128xf32>
    %113 = arith.subf %111, %112 : vector<1x128xf32>
    %114 = arith.mulf %92, %100 : vector<1x128xf32>
    %115 = arith.mulf %88, %104 : vector<1x128xf32>
    %116 = arith.subf %114, %115 : vector<1x128xf32>
    %117 = arith.mulf %88, %102 : vector<1x128xf32>
    %118 = arith.mulf %90, %100 : vector<1x128xf32>
    %119 = arith.subf %117, %118 : vector<1x128xf32>
    %120 = arith.mulf %65, %113 : vector<1x128xf32>
    %121 = arith.mulf %65, %116 : vector<1x128xf32>
    %122 = arith.mulf %65, %119 : vector<1x128xf32>
    %123 = arith.mulf %68, %113 : vector<1x128xf32>
    %124 = arith.mulf %68, %116 : vector<1x128xf32>
    %125 = arith.mulf %68, %119 : vector<1x128xf32>
    %126 = arith.mulf %90, %110 : vector<1x128xf32>
    %127 = arith.mulf %92, %108 : vector<1x128xf32>
    %128 = arith.subf %126, %127 : vector<1x128xf32>
    %129 = arith.mulf %92, %106 : vector<1x128xf32>
    %130 = arith.mulf %88, %110 : vector<1x128xf32>
    %131 = arith.subf %129, %130 : vector<1x128xf32>
    %132 = arith.mulf %88, %108 : vector<1x128xf32>
    %133 = arith.mulf %90, %106 : vector<1x128xf32>
    %134 = arith.subf %132, %133 : vector<1x128xf32>
    %135 = arith.mulf %71, %128 : vector<1x128xf32>
    %136 = arith.addf %120, %135 : vector<1x128xf32>
    %137 = arith.mulf %71, %131 : vector<1x128xf32>
    %138 = arith.addf %121, %137 : vector<1x128xf32>
    %139 = arith.mulf %71, %134 : vector<1x128xf32>
    %140 = arith.addf %122, %139 : vector<1x128xf32>
    %141 = arith.mulf %74, %128 : vector<1x128xf32>
    %142 = arith.addf %123, %141 : vector<1x128xf32>
    %143 = arith.mulf %74, %131 : vector<1x128xf32>
    %144 = arith.addf %124, %143 : vector<1x128xf32>
    %145 = arith.mulf %74, %134 : vector<1x128xf32>
    %146 = arith.addf %125, %145 : vector<1x128xf32>
    %147 = arith.mulf %96, %104 : vector<1x128xf32>
    %148 = arith.mulf %98, %102 : vector<1x128xf32>
    %149 = arith.subf %147, %148 : vector<1x128xf32>
    %150 = arith.mulf %98, %100 : vector<1x128xf32>
    %151 = arith.mulf %94, %104 : vector<1x128xf32>
    %152 = arith.subf %150, %151 : vector<1x128xf32>
    %153 = arith.mulf %94, %102 : vector<1x128xf32>
    %154 = arith.mulf %96, %100 : vector<1x128xf32>
    %155 = arith.subf %153, %154 : vector<1x128xf32>
    %156 = arith.mulf %77, %149 : vector<1x128xf32>
    %157 = arith.addf %136, %156 : vector<1x128xf32>
    %158 = arith.mulf %77, %152 : vector<1x128xf32>
    %159 = arith.addf %138, %158 : vector<1x128xf32>
    %160 = arith.mulf %77, %155 : vector<1x128xf32>
    %161 = arith.addf %140, %160 : vector<1x128xf32>
    %162 = arith.mulf %80, %149 : vector<1x128xf32>
    %163 = arith.addf %142, %162 : vector<1x128xf32>
    %164 = arith.mulf %80, %152 : vector<1x128xf32>
    %165 = arith.addf %144, %164 : vector<1x128xf32>
    %166 = arith.mulf %80, %155 : vector<1x128xf32>
    %167 = arith.addf %146, %166 : vector<1x128xf32>
    %168 = arith.mulf %96, %110 : vector<1x128xf32>
    %169 = arith.mulf %98, %108 : vector<1x128xf32>
    %170 = arith.subf %168, %169 : vector<1x128xf32>
    %171 = arith.mulf %98, %106 : vector<1x128xf32>
    %172 = arith.mulf %94, %110 : vector<1x128xf32>
    %173 = arith.subf %171, %172 : vector<1x128xf32>
    %174 = arith.mulf %94, %108 : vector<1x128xf32>
    %175 = arith.mulf %96, %106 : vector<1x128xf32>
    %176 = arith.subf %174, %175 : vector<1x128xf32>
    %177 = arith.mulf %83, %170 : vector<1x128xf32>
    %178 = arith.addf %157, %177 : vector<1x128xf32>
    %179 = arith.mulf %83, %173 : vector<1x128xf32>
    %180 = arith.addf %159, %179 : vector<1x128xf32>
    %181 = arith.mulf %83, %176 : vector<1x128xf32>
    %182 = arith.addf %161, %181 : vector<1x128xf32>
    %183 = arith.mulf %86, %170 : vector<1x128xf32>
    %184 = arith.addf %163, %183 : vector<1x128xf32>
    %185 = arith.mulf %86, %173 : vector<1x128xf32>
    %186 = arith.addf %165, %185 : vector<1x128xf32>
    %187 = arith.mulf %86, %176 : vector<1x128xf32>
    %188 = arith.addf %167, %187 : vector<1x128xf32>
    %c0_85 = arith.constant 0 : index
    %c0_86 = arith.constant 0 : index
    %c0_87 = arith.constant 0 : index
    %189 = vector.load %arg5[%c0_85, %c0_86, %c0_87] : memref<6x1x128xf32, #tpu.memory_space<vmem>>, vector<1x1x128xf32>
    %190 = vector.shape_cast %189 : vector<1x1x128xf32> to vector<1x128xf32>
    %191 = vector.shape_cast %178 : vector<1x128xf32> to vector<1x1x128xf32>
    tpu.vector_store %arg5[%c0_85, %c0_86, %c0_87], %191 {strides = array<i32>} : memref<6x1x128xf32, #tpu.memory_space<vmem>>, vector<1x1x128xf32>,
    %c1_88 = arith.constant 1 : index
    %c0_89 = arith.constant 0 : index
    %c0_90 = arith.constant 0 : index
    %192 = vector.load %arg5[%c1_88, %c0_89, %c0_90] : memref<6x1x128xf32, #tpu.memory_space<vmem>>, vector<1x1x128xf32>
    %193 = vector.shape_cast %192 : vector<1x1x128xf32> to vector<1x128xf32>
    %194 = vector.shape_cast %180 : vector<1x128xf32> to vector<1x1x128xf32>
    tpu.vector_store %arg5[%c1_88, %c0_89, %c0_90], %194 {strides = array<i32>} : memref<6x1x128xf32, #tpu.memory_space<vmem>>, vector<1x1x128xf32>,
    %c2_91 = arith.constant 2 : index
    %c0_92 = arith.constant 0 : index
    %c0_93 = arith.constant 0 : index
    %195 = vector.load %arg5[%c2_91, %c0_92, %c0_93] : memref<6x1x128xf32, #tpu.memory_space<vmem>>, vector<1x1x128xf32>
    %196 = vector.shape_cast %195 : vector<1x1x128xf32> to vector<1x128xf32>
    %197 = vector.shape_cast %182 : vector<1x128xf32> to vector<1x1x128xf32>
    tpu.vector_store %arg5[%c2_91, %c0_92, %c0_93], %197 {strides = array<i32>} : memref<6x1x128xf32, #tpu.memory_space<vmem>>, vector<1x1x128xf32>,
    %c3_94 = arith.constant 3 : index
    %c0_95 = arith.constant 0 : index
    %c0_96 = arith.constant 0 : index
    %198 = vector.load %arg5[%c3_94, %c0_95, %c0_96] : memref<6x1x128xf32, #tpu.memory_space<vmem>>, vector<1x1x128xf32>
    %199 = vector.shape_cast %198 : vector<1x1x128xf32> to vector<1x128xf32>
    %200 = vector.shape_cast %184 : vector<1x128xf32> to vector<1x1x128xf32>
    tpu.vector_store %arg5[%c3_94, %c0_95, %c0_96], %200 {strides = array<i32>} : memref<6x1x128xf32, #tpu.memory_space<vmem>>, vector<1x1x128xf32>,
    %c4_97 = arith.constant 4 : index
    %c0_98 = arith.constant 0 : index
    %c0_99 = arith.constant 0 : index
    %201 = vector.load %arg5[%c4_97, %c0_98, %c0_99] : memref<6x1x128xf32, #tpu.memory_space<vmem>>, vector<1x1x128xf32>
    %202 = vector.shape_cast %201 : vector<1x1x128xf32> to vector<1x128xf32>
    %203 = vector.shape_cast %186 : vector<1x128xf32> to vector<1x1x128xf32>
    tpu.vector_store %arg5[%c4_97, %c0_98, %c0_99], %203 {strides = array<i32>} : memref<6x1x128xf32, #tpu.memory_space<vmem>>, vector<1x1x128xf32>,
    %c5_100 = arith.constant 5 : index
    %c0_101 = arith.constant 0 : index
    %c0_102 = arith.constant 0 : index
    %204 = vector.load %arg5[%c5_100, %c0_101, %c0_102] : memref<6x1x128xf32, #tpu.memory_space<vmem>>, vector<1x1x128xf32>
    %205 = vector.shape_cast %204 : vector<1x1x128xf32> to vector<1x128xf32>
    %206 = vector.shape_cast %188 : vector<1x128xf32> to vector<1x1x128xf32>
    tpu.vector_store %arg5[%c5_100, %c0_101, %c0_102], %206 {strides = array<i32>} : memref<6x1x128xf32, #tpu.memory_space<vmem>>, vector<1x1x128xf32>,
    return
  }
  func.func @transform_0(%arg0: i32) -> (i32, i32) {
    %c0_i32 = arith.constant 0 : i32
    %c0_i32_0 = arith.constant 0 : i32
    %c0_i32_1 = arith.constant 0 : i32
    return %c0_i32, %c0_i32_0 : i32, i32
  }
  func.func @transform_1(%arg0: i32) -> (i32, i32) {
    %c0_i32 = arith.constant 0 : i32
    %c0_i32_0 = arith.constant 0 : i32
    return %arg0, %c0_i32 : i32, i32
  }
  func.func @transform_2(%arg0: i32) -> (i32, i32, i32) {
    %c0_i32 = arith.constant 0 : i32
    %c0_i32_0 = arith.constant 0 : i32
    %c0_i32_1 = arith.constant 0 : i32
    return %c0_i32, %arg0, %c0_i32_0 : i32, i32, i32
  }
  func.func @transform_3(%arg0: i32) -> (i32, i32, i32) {
    %c0_i32 = arith.constant 0 : i32
    %c0_i32_0 = arith.constant 0 : i32
    %c0_i32_1 = arith.constant 0 : i32
    return %c0_i32, %arg0, %c0_i32_0 : i32, i32, i32
  }
  func.func @transform_4(%arg0: i32) -> (i32, i32, i32) {
    %c0_i32 = arith.constant 0 : i32
    %c0_i32_0 = arith.constant 0 : i32
    %c0_i32_1 = arith.constant 0 : i32
    return %c0_i32, %arg0, %c0_i32_0 : i32, i32, i32
  }
}

</mosaic_0001>

<bundles_post_ra>
// kernel: tpu_custom_call.1
= control target key start
LH: loop header
LB: loop body
LE: loop exit
PB: predicated region body
PF: predicated region fallthrough
CT: control target
= control target key end

     0   :  { %9 = vsyncpa [#allocation5], 0  ;;  %s683_s0 = inlined_call_operand.hbm [shape: f32[3,8], index: 0, kind: input, shape index: {}]   ;;  %s684_s1 = inlined_call_operand.hbm [shape: s32[1,128], index: 1, kind: input, shape index: {}]   ;;  %s685_s2 = inlined_call_operand.hbm [shape: f32[6,1,128], index: 2, kind: input, shape index: {}]   ;;  %s686_s3 = inlined_call_operand.hbm [shape: f32[6,1,128], index: 3, kind: input, shape index: {}]   ;;  %s687_s4 = inlined_call_operand.hbm [shape: f32[6,1,128], index: 4, kind: output, shape index: {}]  }
   0x1   :  { %10 = vsyncpa [#allocation3], 0 }
   0x2   :  { %11 = vsyncpa [#allocation8], 0  ;;  %s37_s17 = sshll.u32 %s685_s2, 4  ;;  %s38_s17 = int_to_ptr.hbm [resolvable:$true] %s37_s17 }
   0x3   :  { %12 = vsyncpa [#allocation4], 0  ;;  %s430_s18 = smov [#allocation7]   ;;  %s18_s22 = sshll.u32 %s683_s0, 4  ;;  %s19_s22 = int_to_ptr.hbm [resolvable:$true] %s18_s22 }
   0x4   :  { %s39_s19 = sshll.u32 %s430_s18, 4  ;;  %s431_s23 = smov 16   ;;  %s40_s19 = int_to_ptr.vmem [resolvable:$true] %s39_s19 }
   0x5   :  { %s432_s24 = smov 1   ;;  %s433_s25 = smov [#allocation2]  }
   0x6   :  { %45 = dma.hbm_to_vmem [thread:$0]  %s38_s17, 96, %s40_s19, [#allocation8], %s431_s23, %s431_s23, %s432_s24  }
   0x7   :  { %21 = dma.hbm_to_smem %s19_s22, 64, %s433_s25, [#allocation5]  }
   0x8   :  { %s27_s27 = sshll.u32 %s684_s1, 4  ;;  %s434_s28 = smov [#allocation6]   ;;  %s28_s27 = int_to_ptr.hbm [resolvable:$true] %s27_s27 }
   0x9   :  { %s29_s29 = sshll.u32 %s434_s28, 4  ;;  %s50_s0 = sshll.u32 %s686_s3, 4  ;;  %s30_s29 = int_to_ptr.vmem [resolvable:$true] %s29_s29  ;;  %s51_s0 = int_to_ptr.hbm [resolvable:$true] %s50_s0 }
   0xa   :  { %32 = dma.hbm_to_vmem [thread:$0]  %s28_s27, 16, %s30_s29, [#allocation3]  }
   0xb   :  { %s435_s6 = smov [#allocation9]  }
   0xc   :  { %s52_s7 = sshll.u32 %s435_s6, 4  ;;  %s53_s7 = int_to_ptr.vmem [resolvable:$true] %s52_s7 }
   0xd   :  { %58 = dma.hbm_to_vmem [thread:$0]  %s51_s0, 96, %s53_s7, [#allocation8], %s431_s23, %s431_s23, %s432_s24  }
   0xe   :  { %422 = dma.done.wait [#allocation5], 64  }
   0xf   :  { %423 = vsyncadd [#allocation5], 4294967232 }
  0x10   :  { %424 = dma.done.wait [#allocation3], 16  }
  0x11   :  { %425 = vsyncadd [#allocation3], 4294967280 }
  0x12   :  { %426 = dma.done.wait [#allocation8], 192  }
  0x13   :  { %427 = vsyncadd [#allocation8], 4294967104 }
  0x14   :  { %75 = sfence }
  0x15   :  { %v480_v0 = vld [vmem:[#allocation6] sm:$0x1]  ;;  %s78_s1 = sld [smem:[#allocation2]]  ;;  %v486_v1 = vld [vmem:[#allocation7 + $0x1] sm:$0x1]  ;;  %s436_s5 = smov [#allocation10]  }
  0x16   :  { %vm77_vm0 = vcmp.eq.s32.totalorder %v480_v0, 0  ;;  %s483_s3 = sld [smem:[#allocation2 + $0x2]]  ;;  %vm102_vm1 = vcmp.eq.s32.totalorder %v480_v0, 1  ;;  %v156_v2 = vld [vmem:[#allocation7 + $0x2] sm:$0x1]  ;;  %vm127_vm2 = vcmp.eq.s32.totalorder %v480_v0, 2 }
  0x17   :  { %s488_s8 = sld [smem:[#allocation2 + $0x4]]  ;;  %v490_v3 = vld [vmem:[#allocation7 + $0x4] sm:$0x1]  ;;  %v162_v4 = vld [vmem:[#allocation7 + $0x5] sm:$0x1]  ;;  %s267_s0 = sshll.u32 %s436_s5, 4  ;;  %s268_s0 = int_to_ptr.vmem [resolvable:$true] %s267_s0 }
  0x18   :  { %s492_s9 = sld [smem:[#allocation2 + $0x6]]  ;;  %v494_v5 = vld [vmem:[#allocation9 + $0x1] sm:$0x1]  ;;  %v167_v6 = vld [vmem:[#allocation9 + $0x2] sm:$0x1] }
  0x19   :  { %s496_s10 = sld [smem:[#allocation2 + $0x80]]  ;;  %v499_v7 = vld [vmem:[#allocation9 + $0x4] sm:$0x1]  ;;  %v175_v8 = vmul.f32 %v494_v5, %v156_v2  ;;  %v211_v9 = vmul.f32 %v494_v5, %v162_v4  ;;  %v173_v10 = vld [vmem:[#allocation9 + $0x5] sm:$0x1]  ;;  %v174_v11 = vmul.f32 %v167_v6, %v486_v1  ;;  %v210_v13 = vmul.f32 %v167_v6, %v490_v3 }
  0x1a   :  { %s503_s11 = sld [smem:[#allocation2 + $0x82]]  ;;  %v190_v12 = vmul.f32 %v499_v7, %v156_v2  ;;  %v232_v14 = vmul.f32 %v499_v7, %v162_v4  ;;  %v152_v15 = vld [vmem:[#allocation7] sm:$0x1]  ;;  %v189_v17 = vmul.f32 %v173_v10, %v486_v1  ;;  %v231_v18 = vmul.f32 %v173_v10, %v490_v3  ;;  %v513_v19 = vld [vmem:[#allocation9] sm:$0x1] }
  0x1b   :  { %v79_v16 = vstv %s78_s1  ;;  %s509_s12 = sld [smem:[#allocation2 + $0x84]]  ;;  %v178_v20 = vmul.f32 %v167_v6, %v152_v15  ;;  %v520_v23 = vsub.f32 %v174_v11, %v175_v8  ;;  %v522_v24 = vsub.f32 %v210_v13, %v211_v9  ;;  %v524_v25 = vld [vmem:[#allocation9 + $0x3] sm:$0x1]  ;;  %v535_v30 = vld [vmem:[#allocation7 + $0x3] sm:$0x1]  ;;  %s269_s1 = sshll.u32 %s687_s4, 4  ;;  %s270_s1 = int_to_ptr.hbm [resolvable:$true] %s269_s1 }
  0x1c   :  { %v80_v21 = vsel %vm77_vm0, %v79_v16, 0.0  ;;  %v85_v22 = vstv %s483_s3  ;;  %s518_s13 = sld [smem:[#allocation2 + $0x86]]  ;;  %v531_v28 = vsub.f32 %v189_v17, %v190_v12  ;;  %v533_v29 = vsub.f32 %v231_v18, %v232_v14 }
  0x1d   :  { %v86_v26 = vsel %vm77_vm0, %v85_v22, 0.0  ;;  %v91_v27 = vstv %s488_s8  ;;  %s529_s14 = sld [smem:[#allocation2 + $0x100]]  ;;  %v177_v33 = vmul.f32 %v513_v19, %v156_v2  ;;  %v192_v34 = vmul.f32 %v524_v25, %v156_v2 }
  0x1e   :  { %v92_v31 = vsel %vm77_vm0, %v91_v27, 0.0  ;;  %v97_v32 = vstv %s492_s9  ;;  %s540_s15 = sld [smem:[#allocation2 + $0x102]]  ;;  %v193_v37 = vmul.f32 %v173_v10, %v152_v15  ;;  %v213_v38 = vmul.f32 %v513_v19, %v162_v4 }
  0x1f   :  { %v98_v35 = vsel %vm77_vm0, %v97_v32, 0.0  ;;  %v104_v36 = vstv %s496_s10  ;;  %s547_s16 = sld [smem:[#allocation2 + $0x104]]  ;;  %v555_v41 = vsub.f32 %v177_v33, %v178_v20  ;;  %v214_v42 = vmul.f32 %v167_v6, %v535_v30 }
  0x20   :  { %v105_v39 = vsel %vm102_vm1, %v104_v36, %v80_v21  ;;  %v110_v40 = vstv %s503_s11  ;;  %s553_s17 = sld [smem:[#allocation2 + $0x106]]  ;;  %v561_v45 = vsub.f32 %v192_v34, %v193_v37  ;;  %v234_v46 = vmul.f32 %v524_v25, %v162_v4 }
  0x21   :  { %v111_v43 = vsel %vm102_vm1, %v110_v40, %v86_v26  ;;  %v116_v44 = vstv %s509_s12  ;;  %s564_s18 = sld [smem:[#allocation2 + $0x1]]  ;;  %v569_v49 = vsub.f32 %v213_v38, %v214_v42  ;;  %v235_v50 = vmul.f32 %v173_v10, %v535_v30 }
  0x22   :  { %v117_v47 = vsel %vm102_vm1, %v116_v44, %v92_v31  ;;  %v122_v48 = vstv %s518_s13  ;;  %s572_s19 = sld [smem:[#allocation2 + $0x3]]  ;;  %v180_v53 = vmul.f32 %v494_v5, %v152_v15  ;;  %v181_v54 = vmul.f32 %v513_v19, %v486_v1 }
  0x23   :  { %v123_v51 = vsel %vm102_vm1, %v122_v48, %v98_v35  ;;  %v129_v52 = vstv %s529_s14  ;;  %s580_s20 = sld [smem:[#allocation2 + $0x5]]  ;;  %v585_v57 = vsub.f32 %v234_v46, %v235_v50  ;;  %v195_v58 = vmul.f32 %v499_v7, %v152_v15 }
  0x24   :  { %v130_v55 = vsel %vm127_vm2, %v129_v52, %v105_v39  ;;  %v135_v56 = vstv %s540_s15  ;;  %s588_s21 = sld [smem:[#allocation2 + $0x7]]  ;;  %v608_v11 = vsub.f32 %v180_v53, %v181_v54  ;;  %v196_v17 = vmul.f32 %v524_v25, %v486_v1 }
  0x25   :  { %v136_v59 = vsel %vm127_vm2, %v135_v56, %v111_v43  ;;  %v141_v60 = vstv %s547_s16  ;;  %v183_v61 = vmul.f32 %v520_v23, %v130_v55  ;;  %v184_v62 = vmul.f32 %v555_v41, %v130_v55  ;;  %s595_s22 = sld [smem:[#allocation2 + $0x81]] }
  0x26   :  { %v142_v63 = vsel %vm127_vm2, %v141_v60, %v117_v47  ;;  %v147_v2 = vstv %s553_s17  ;;  %v198_v4 = vmul.f32 %v531_v28, %v136_v59  ;;  %v200_v6 = vmul.f32 %v561_v45, %v136_v59  ;;  %s602_s25 = sld [smem:[#allocation2 + $0x83]] }
  0x27   :  { %v148_v8 = vsel %vm127_vm2, %v147_v2, %v123_v51  ;;  %v219_v9 = vmul.f32 %v522_v24, %v142_v63  ;;  %v221_v10 = vmul.f32 %v569_v49, %v142_v63  ;;  %s610_s26 = sld [smem:[#allocation2 + $0x85]]  ;;  %v185_v16 = vmul.f32 %v608_v11, %v130_v55 }
  0x28   :  { %v199_v12 = vadd.f32 %v198_v4, %v183_v61  ;;  %v240_v13 = vmul.f32 %v533_v29, %v148_v8  ;;  %v201_v14 = vadd.f32 %v200_v6, %v184_v62  ;;  %v242_v15 = vmul.f32 %v585_v57, %v148_v8  ;;  %s614_s2 = sld [smem:[#allocation2 + $0x87]] }
  0x29   :  { %v216_v18 = vmul.f32 %v494_v5, %v535_v30  ;;  %v217_v20 = vmul.f32 %v513_v19, %v490_v3  ;;  %s623_s27 = sld [smem:[#allocation2 + $0x101]]  ;;  %v237_v26 = vmul.f32 %v499_v7, %v535_v30  ;;  %v238_v27 = vmul.f32 %v524_v25, %v490_v3 }
  0x2a   :  { %v220_v21 = vadd.f32 %v219_v9, %v199_v12  ;;  %v222_v22 = vadd.f32 %v221_v10, %v201_v14  ;;  %s629_s28 = sld [smem:[#allocation2 + $0x103]]  ;;  %v197_v1 = vsub.f32 %v195_v58, %v196_v17  ;;  %v82_v5 = vstv %s564_s18 }
  0x2b   :  { %v218_v31 = vsub.f32 %v216_v18, %v217_v20  ;;  %v88_v32 = vstv %s572_s19  ;;  %s633_s29 = sld [smem:[#allocation2 + $0x105]]  ;;  %v239_v34 = vsub.f32 %v237_v26, %v238_v27  ;;  %v83_v7 = vsel %vm77_vm0, %v82_v5, 0.0 }
  0x2c   :  { %v241_v19 = vadd.f32 %v240_v13, %v220_v21  ;;  %v243_v33 = vadd.f32 %v242_v15, %v222_v22  ;;  %s306_s30 = sld [smem:[#allocation2 + $0x107]]  ;;  %v202_v3 = vmul.f32 %v197_v1, %v136_v59  ;;  %v89_v30 = vsel %vm77_vm0, %v88_v32, 0.0 }
  0x2d   :  { %v223_v25 = vmul.f32 %v218_v31, %v142_v63  ;;  %v94_v35 = vstv %s580_s20  ;;  %v244_v36 = vmul.f32 %v239_v34, %v148_v8  ;;  %v100_v38 = vstv %s588_s21 }
  0x2e   :  { %252 = vst [vmem:[#allocation10] sm:$0x1] %v241_v19  ;;  %v95_v37 = vsel %vm77_vm0, %v94_v35, 0.0  ;;  %v107_v39 = vstv %s595_s22  ;;  %v203_v40 = vadd.f32 %v202_v3, %v185_v16  ;;  %v101_v42 = vsel %vm77_vm0, %v100_v38, 0.0 }
  0x2f   :  { %254 = vst [vmem:[#allocation10 + $0x1] sm:$0x1] %v243_v33  ;;  %v108_v43 = vsel %vm102_vm1, %v107_v39, %v83_v7  ;;  %v113_v44 = vstv %s602_s25  ;;  %v119_v47 = vstv %s610_s26  ;;  %v125_v48 = vstv %s614_s2 }
  0x30   :  { %v114_v46 = vsel %vm102_vm1, %v113_v44, %v89_v30  ;;  %v132_v50 = vstv %s623_s27  ;;  %v224_v51 = vadd.f32 %v223_v25, %v203_v40  ;;  %v120_v52 = vsel %vm102_vm1, %v119_v47, %v95_v37 }
  0x31   :  { %v126_v53 = vsel %vm102_vm1, %v125_v48, %v101_v42  ;;  %v133_v54 = vsel %vm127_vm2, %v132_v50, %v108_v43  ;;  %v138_v55 = vstv %s629_s28  ;;  %v144_v56 = vstv %s633_s29 }
  0x32   :  { %v150_v58 = vstv %s306_s30  ;;  %v186_v59 = vmul.f32 %v520_v23, %v133_v54  ;;  %v245_v60 = vadd.f32 %v244_v36, %v224_v51  ;;  %v139_v61 = vsel %vm127_vm2, %v138_v55, %v114_v46 }
  0x33   :  { %v145_v62 = vsel %vm127_vm2, %v144_v56, %v120_v52  ;;  %v151_v63 = vsel %vm127_vm2, %v150_v58, %v126_v53  ;;  %v204_v2 = vmul.f32 %v531_v28, %v139_v61  ;;  %v187_v6 = vmul.f32 %v555_v41, %v133_v54 }
  0x34   :  { %v225_v4 = vmul.f32 %v522_v24, %v145_v62  ;;  %256 = vst [vmem:[#allocation10 + $0x2] sm:$0x1] %v245_v60  ;;  %v206_v8 = vmul.f32 %v561_v45, %v139_v61  ;;  %v227_v23 = vmul.f32 %v569_v49, %v145_v62  ;;  %v188_v9 = vmul.f32 %v608_v11, %v133_v54 }
  0x35   :  { %v205_v10 = vadd.f32 %v204_v2, %v186_v59  ;;  %v246_v12 = vmul.f32 %v533_v29, %v151_v63  ;;  %v208_v13 = vmul.f32 %v197_v1, %v139_v61  ;;  %v229_v14 = vmul.f32 %v218_v31, %v145_v62 }
  0x36   :  { %v207_v0 = vadd.f32 %v206_v8, %v187_v6  ;;  %v248_v15 = vmul.f32 %v585_v57, %v151_v63  ;;  %v250_v24 = vmul.f32 %v239_v34, %v151_v63 }
  0x37   :  { %v226_v28 = vadd.f32 %v225_v4, %v205_v10  ;;  %v209_v16 = vadd.f32 %v208_v13, %v188_v9 }
  0x38   :  { %v228_v17 = vadd.f32 %v227_v23, %v207_v0 }
  0x39   :  { %v247_v41 = vadd.f32 %v246_v12, %v226_v28  ;;  %v230_v45 = vadd.f32 %v229_v14, %v209_v16 }
  0x3a   :  { %v249_v49 = vadd.f32 %v248_v15, %v228_v17 }
  0x3b   :  { %258 = vst [vmem:[#allocation10 + $0x3] sm:$0x1] %v247_v41  ;;  %v251_v29 = vadd.f32 %v250_v24, %v230_v45 }
  0x3c   :  { %260 = vst [vmem:[#allocation10 + $0x4] sm:$0x1] %v249_v49 }
  0x3d   :  { %262 = vst [vmem:[#allocation10 + $0x5] sm:$0x1] %v251_v29 }
  0x3e   :  { %275 = dma.vmem_to_hbm [thread:$0]  %s268_s0, 96, %s270_s1, [#allocation4], %s431_s23, %s431_s23, %s432_s24  }
  0x3f   :  { %428 = dma.done.wait [#allocation4], 96  }
  0x40   :  { %429 = vsyncadd [#allocation4], 4294967200 }
  0x41   :  { %280 = vsyncpa [#allocation3], 1 }
  0x42   :  { %281 = vsyncpa [#allocation8], 1 }
  0x43   :  { %282 = vsyncpa [#allocation4], 1 }
  0x44   :  { %283 = vsyncpa [#allocation5], 1 }

</bundles_post_ra>
